<compile_context>
chip_gen: v7x
topology: tpu7x:2x2x1
jax: 0.10.0
libtpu: 0.0.40
codegen_flags: <defaults>
</compile_context>

<pallas_src>
import functools

import jax
import jax.numpy as jnp
import numpy as np
from jax import lax
from jax.experimental import pallas as pl
from jax.experimental.pallas import tpu as pltpu


def _round_up(x, m):
    return (x + m - 1) // m * m


@functools.lru_cache(maxsize=None)
def _vmem_budgets():
    """Per-generation VMEM budgets (vmem_limit, fused_block_budget, tile_budget).

    v5e/v6e (128 MiB physical) -> ~112 MiB limit, ~95 MiB fused-block budget.
    v7x      (64 MiB physical) -> ~56 MiB limit, ~47 MiB fused-block budget.
    """
    mib = 1 << 20

    info_phys = None
    try:  # preferred: ask the runtime directly
        cap = getattr(pltpu.get_tpu_info(), "vmem_capacity_bytes", None)
        if cap:
            info_phys = int(cap)
    except Exception:
        info_phys = None

    kind_phys = None
    try:  # fallback / sanity cross-check: device kind string
        kind = jax.devices()[0].device_kind.lower()
    except Exception:
        kind = ""
    if "v7" in kind or "7x" in kind:
        kind_phys = 64 * mib
    elif any(s in kind for s in ("v4", "v5", "v6")):
        kind_phys = 128 * mib
    elif any(s in kind for s in ("v2", "v3")):
        kind_phys = 16 * mib

    if info_phys and kind_phys:
        phys = min(info_phys, kind_phys)
    else:
        phys = info_phys or kind_phys or 64 * mib   # unknown: v7x-safe default

    vmem_limit = min(phys - 8 * mib, (phys * 7) // 8)
    fused_budget = (vmem_limit * 85) // 100
    tile_budget = max(4 * mib, vmem_limit // 2 - 2 * mib)
    return int(vmem_limit), int(fused_budget), int(tile_budget)


def _conv_sigmoid(pooled_f32, w_ref, b_ref, ksize, c):
    """sigmoid(Conv1d(1, 1, ksize, zero-pad)) over the channel (sublane) axis.

    pooled_f32: (C, 1) float32.  Returns (C, 1) float32.  Uses pltpu.roll
    (XLU sublane rotate) + a validity mask to emulate zero padding.
    """
    pad = (ksize - 1) // 2
    idx = lax.broadcasted_iota(jnp.int32, (c, 1), 0)
    y = jnp.full((c, 1), b_ref[0], dtype=jnp.float32)
    for k in range(ksize):                                  # tiny static unroll
        off = k - pad
        # shifted[i] = pooled[i + off] (cyclic); mask kills wrapped taps.
        shifted = pltpu.roll(pooled_f32, shift=(-off) % c, axis=0)
        valid = (idx >= -off) & (idx < c - off)
        y = y + w_ref[k] * jnp.where(valid, shifted, 0.0)
    return jax.nn.sigmoid(y)


# ---------------------------------------------------------------------------
# Fused path: whole (bt, C, HW) block per grid step, single pass over x.
# ---------------------------------------------------------------------------
def _make_fused_kernel(ksize, c, hw, bt, lane_chunk):
    inv_hw = 1.0 / float(hw)
    n_full = hw // lane_chunk
    rem = hw - n_full * lane_chunk
    rem_off = n_full * lane_chunk

    def kernel(w_ref, b_ref, x_ref, o_ref, acc_ref):
        out_dtype = o_ref.dtype
        for b in range(bt):               # small static unroll over packed batch rows
            # ---- spatial mean, f32-accumulated, lane-chunked ----
            acc_ref[...] = jnp.zeros_like(acc_ref)

            if n_full > 0:
                @pl.loop(0, n_full)
                def _(j):
                    start = pl.multiple_of(j * lane_chunk, 128)
                    xc = x_ref[b, :, pl.ds(start, lane_chunk)]       # (C, chunk)
                    acc_ref[...] += jnp.sum(xc, axis=1, keepdims=True,
                                            dtype=jnp.float32)
            if rem > 0:
                xc = x_ref[b, :, pl.ds(rem_off, rem)]
                acc_ref[...] += jnp.sum(xc, axis=1, keepdims=True,
                                        dtype=jnp.float32)

            # ---- Conv1d over channels + sigmoid on the tiny (C, 1) vector ----
            # Reuse the accumulator scratch to hold the gate so the multiply
            # loop re-reads it from VMEM (no captured vector loop constants).
            acc_ref[...] = _conv_sigmoid(acc_ref[...] * inv_hw, w_ref, b_ref,
                                         ksize, c)

            # ---- lane-dense broadcast multiply + store ----
            if n_full > 0:
                @pl.loop(0, n_full)
                def _(j):
                    start = pl.multiple_of(j * lane_chunk, 128)
                    gate = acc_ref[...].astype(out_dtype)            # (C, 1)
                    o_ref[b, :, pl.ds(start, lane_chunk)] = (
                        x_ref[b, :, pl.ds(start, lane_chunk)] * gate)
            if rem > 0:
                gate = acc_ref[...].astype(out_dtype)
                o_ref[b, :, pl.ds(rem_off, rem)] = (
                    x_ref[b, :, pl.ds(rem_off, rem)] * gate)

    return kernel


# ---------------------------------------------------------------------------
# Tiled path, pass 1: pooled reduction over HW tiles + conv + sigmoid.
# ---------------------------------------------------------------------------
def _make_pool_kernel(ksize, c, hw, tile, n_tiles):
    inv_hw = 1.0 / float(hw)
    needs_mask = (hw % tile) != 0

    def kernel(w_ref, b_ref, x_ref, scale_ref, acc_ref):
        t = pl.program_id(1)

        @pl.when(t == 0)
        def _():
            acc_ref[...] = jnp.zeros_like(acc_ref)

        def accumulate(mask_last):
            xblk = x_ref[0]                                          # (C, tile)
            if mask_last:
                lane = (lax.broadcasted_iota(jnp.int32, (c, tile), 1)
                        + (n_tiles - 1) * tile)
                xblk = jnp.where(lane < hw, xblk, jnp.zeros_like(xblk))
            acc_ref[...] += jnp.sum(xblk, axis=1, keepdims=True,
                                    dtype=jnp.float32)

        if needs_mask:
            # Mask only the final (partial) tile; full tiles take the cheap path.
            @pl.when(t < n_tiles - 1)
            def _():
                accumulate(False)

            @pl.when(t == n_tiles - 1)
            def _():
                accumulate(True)
        else:
            accumulate(False)

        @pl.when(t == n_tiles - 1)
        def _():
            scale_ref[0] = _conv_sigmoid(acc_ref[...] * inv_hw, w_ref, b_ref,
                                         ksize, c)

    return kernel


# ---------------------------------------------------------------------------
# Tiled path, pass 2: lane-dense broadcast multiply (all grid axes parallel).
# ---------------------------------------------------------------------------
def _mul_kernel(scale_ref, x_ref, o_ref):
    x = x_ref[...]                                # (1, c_tile, t_mul)
    o_ref[...] = x * scale_ref[...].astype(x.dtype)


def eca_attention(x_nchw, conv_w, conv_b, kernel_size=3, *,
                  force_tiled=False, hw_tile=None, fused_lane_chunk=None,
                  alias_input=True):
    """x_nchw: (B, C, H, W); conv_w: (kernel_size,) f32; conv_b: (1,) f32."""
    B, C, H, W = x_nchw.shape
    HW = H * W
    pad = (kernel_size - 1) // 2
    assert C > pad, "ECA needs more channels than the conv half-width"

    x = x_nchw.reshape(B, C, HW)            # contiguous reshape: no HBM traffic
    itemsize = int(jnp.dtype(x.dtype).itemsize)
    conv_w = jnp.asarray(conv_w, dtype=jnp.float32)
    conv_b = jnp.asarray(conv_b, dtype=jnp.float32)

    vmem_limit, fused_budget, tile_budget = _vmem_budgets()

    c_pad = _round_up(C, 16)                # sublane padding (covers bf16 packing)
    hw_pad = _round_up(HW, 128)             # lane padding
    per_batch = 4 * c_pad * hw_pad * itemsize    # in + out, double-buffered

    use_fused = (not force_tiled) and per_batch <= fused_budget

    if use_fused:
        # Pack several batch elements per grid step so small activations
        # amortize the ~0.35us/step overhead; keep >=2 grid steps when B
        # allows it (pipelining + megacore sharding of the parallel axis).
        bt = max(1, (8 << 20) // per_batch)
        bt = min(bt, 8, B)
        if B >= 2:
            bt = max(1, min(bt, B // 2))
        nb = -(-B // bt)

        if fused_lane_chunk is not None:
            assert fused_lane_chunk % 128 == 0
            lane_chunk = int(fused_lane_chunk)
        else:
            # ~512K elements per vector op keeps Mosaic's unroll bounded even
            # for very large VMEM-resident blocks.
            lane_chunk = max(128, ((512 * 1024) // C) // 128 * 128)
        lane_chunk = min(lane_chunk, hw_pad)

        out = pl.pallas_call(
            _make_fused_kernel(kernel_size, C, HW, bt, lane_chunk),
            out_shape=jax.ShapeDtypeStruct((B, C, HW), x.dtype),
            grid_spec=pltpu.PrefetchScalarGridSpec(
                num_scalar_prefetch=0,
                grid=(nb,),
                in_specs=[
                    pl.BlockSpec(memory_space=pltpu.MemorySpace.SMEM),  # conv weight
                    pl.BlockSpec(memory_space=pltpu.MemorySpace.SMEM),  # conv bias
                    pl.BlockSpec((bt, C, HW), lambda i: (i, 0, 0)),
                ],
                out_specs=pl.BlockSpec((bt, C, HW), lambda i: (i, 0, 0)),
                scratch_shapes=[pltpu.VMEM((C, 1), jnp.float32)],
            ),
            compiler_params=pltpu.CompilerParams(
                dimension_semantics=("parallel",),
                vmem_limit_bytes=vmem_limit),
            cost_estimate=pl.CostEstimate(
                flops=3 * B * C * HW,
                transcendentals=B * C,
                bytes_accessed=2 * B * C * HW * itemsize),
            input_output_aliases=({2: 0} if alias_input else {}),
        )(conv_w, conv_b, x)
        return out.reshape(B, C, H, W)

    # ------------------- tiled two-pass fallback -------------------
    buf_cap = 4 << 20                    # per-buffer block cap: 85-86% HBM-roofline
                                         # knee, keeps Mosaic's per-op unroll modest
    mul_buf = min(tile_budget // 4, buf_cap)     # mul pass: x in + out, double-buffered
    pool_buf = min(tile_budget // 2, buf_cap)    # pool pass only double-buffers input

    # Channel split for the multiply pass (only triggers for extreme C).
    c_tile = C
    if c_pad * 128 * itemsize > mul_buf:
        c_tile = max(8, ((mul_buf // (128 * itemsize)) // 8) * 8)
    n_c = -(-C // c_tile)
    ct_pad = _round_up(c_tile, 16)

    if hw_tile is not None:
        assert hw_tile % 128 == 0, "hw_tile must be a multiple of 128"
        t_pool = t_mul = int(hw_tile)
    else:
        t_pool = max(128, (pool_buf // (c_pad * itemsize)) // 128 * 128)
        t_mul = max(128, (mul_buf // (ct_pad * itemsize)) // 128 * 128)
    t_pool = min(t_pool, hw_pad)
    t_mul = min(t_mul, hw_pad)
    n_pool = -(-HW // t_pool)
    n_mul = -(-HW // t_mul)

    scale = pl.pallas_call(
        _make_pool_kernel(kernel_size, C, HW, t_pool, n_pool),
        out_shape=jax.ShapeDtypeStruct((B, C, 1), jnp.float32),
        grid_spec=pltpu.PrefetchScalarGridSpec(
            num_scalar_prefetch=0,
            grid=(B, n_pool),
            in_specs=[
                pl.BlockSpec(memory_space=pltpu.MemorySpace.SMEM),
                pl.BlockSpec(memory_space=pltpu.MemorySpace.SMEM),
                pl.BlockSpec((1, C, t_pool), lambda b, t: (b, 0, t)),
            ],
            out_specs=pl.BlockSpec((1, C, 1), lambda b, t: (b, 0, 0)),
            scratch_shapes=[pltpu.VMEM((C, 1), jnp.float32)],
        ),
        compiler_params=pltpu.CompilerParams(
            dimension_semantics=("parallel", "arbitrary"),
            vmem_limit_bytes=vmem_limit),
        cost_estimate=pl.CostEstimate(
            flops=B * C * HW,
            transcendentals=B * C,
            bytes_accessed=B * C * HW * itemsize + B * C * 4),
    )(conv_w, conv_b, x)

    out = pl.pallas_call(
        _mul_kernel,
        out_shape=jax.ShapeDtypeStruct((B, C, HW), x.dtype),
        grid_spec=pltpu.PrefetchScalarGridSpec(
            num_scalar_prefetch=0,
            grid=(B, n_c, n_mul),
            in_specs=[
                pl.BlockSpec((1, c_tile, 1), lambda b, ci, t: (b, ci, 0)),
                pl.BlockSpec((1, c_tile, t_mul), lambda b, ci, t: (b, ci, t)),
            ],
            out_specs=pl.BlockSpec((1, c_tile, t_mul),
                                   lambda b, ci, t: (b, ci, t)),
        ),
        compiler_params=pltpu.CompilerParams(
            dimension_semantics=("parallel", "parallel", "parallel"),
            vmem_limit_bytes=vmem_limit),
        cost_estimate=pl.CostEstimate(
            flops=B * C * HW,
            transcendentals=0,
            bytes_accessed=2 * B * C * HW * itemsize + B * C * 4),
        input_output_aliases=({1: 0} if alias_input else {}),
    )(scale, x)
    return out.reshape(B, C, H, W)


def eca_attention_ref(x_nchw, conv_w, conv_b):
    """Pure-JAX reference mirroring the PyTorch forward."""
    B, C, H, W = x_nchw.shape
    pooled = jnp.mean(x_nchw.astype(jnp.float32), axis=(2, 3))        # (B, C)
    k = conv_w.shape[0]
    pad = (k - 1) // 2
    padded = jnp.pad(pooled, ((0, 0), (pad, pad)))                    # (B, C + 2*pad)
    y = conv_b[0] + sum(conv_w[i] * padded[:, i:i + C] for i in range(k))
    scale = jax.nn.sigmoid(y)                                         # (B, C)
    return (x_nchw.astype(jnp.float32) * scale[:, :, None, None]).astype(x_nchw.dtype)


if __name__ == "__main__":
    key = jax.random.PRNGKey(0)
    kx, kw, kb = jax.random.split(key, 3)

    kernel_size = 3
    # Deterministic Conv1d(1, 1, kernel_size) parameters (synthetic init).
    conv_w = jax.random.normal(kw, (kernel_size,), dtype=jnp.float32) * 0.5
    conv_b = jax.random.normal(kb, (1,), dtype=jnp.float32) * 0.1

    def check(shape, seed, dtype=jnp.float32, tol=1e-5, **kwargs):
        x = jax.random.normal(jax.random.fold_in(kx, seed), shape,
                              dtype=jnp.float32).astype(dtype)
        ref = np.asarray(jax.block_until_ready(
            eca_attention_ref(x, conv_w, conv_b)), dtype=np.float32)
        out = np.asarray(jax.block_until_ready(
            eca_attention(x, conv_w, conv_b, kernel_size=kernel_size,
                          **kwargs)), dtype=np.float32)
        np.testing.assert_allclose(out, ref, rtol=tol, atol=tol)

    # Fused single-pass path (no HBM aliasing).
    check((2, 16, 16, 16), seed=0, alias_input=False)
    # Fused path with HW < 128 (masked lane loads / stores).
    check((2, 16, 7, 7), seed=1)
    # Fused path packing >1 batch element per grid step (B=5 -> bt=2, padded block).
    check((5, 16, 8, 16), seed=2)
    # Fused path exercising the in-kernel lane-chunk loop (exact chunks).
    check((2, 16, 16, 24), seed=3, fused_lane_chunk=128)
    # Fused path, lane-chunk loop plus a partial remainder chunk.
    check((2, 16, 10, 20), seed=4, fused_lane_chunk=128)
    # Tiled two-pass path, HW divisible by the tile.
    check((2, 16, 16, 24), seed=5, force_tiled=True, hw_tile=128)
    # Tiled two-pass path with a masked last HW tile.
    check((2, 16, 10, 20), seed=6, force_tiled=True, hw_tile=128)
    # Tiled path with auto-picked tile sizes.
    check((2, 16, 16, 24), seed=7, force_tiled=True)
    # bf16 activations (gate cast to bf16 before the multiply -> ~1-ulp tolerance).
    check((2, 16, 7, 7), seed=8, dtype=jnp.bfloat16, tol=2e-2)

    print("KERNEL_OK")
</pallas_src>

<mosaic_0001>
module attributes {stable_mosaic.version = 11 : i64} {
  func.func @kernel(%arg0: i32, %arg1: memref<3xf32, #tpu.memory_space<smem>>, %arg2: memref<1xf32, #tpu.memory_space<smem>>, %arg3: memref<1x16x256xf32, #tpu.memory_space<vmem>>, %arg4: memref<1x16x256xf32, #tpu.memory_space<vmem>>, %arg5: memref<16x1xf32, #tpu.memory_space<vmem>>) attributes {dimension_semantics = [#tpu.dimension_semantics<parallel>], iteration_bounds = array<i64: 2>, scalar_prefetch = 0 : i64, scratch_operands = 1 : i64, tpu.core_type = #tpu.core_type<tc>, window_params = [{transform_indices = @transform_0, window_bounds = array<i64: 3>}, {transform_indices = @transform_1, window_bounds = array<i64: 1>}, {transform_indices = @transform_2, window_bounds = array<i64: 1, 16, 256>}, {transform_indices = @transform_3, window_bounds = array<i64: 1, 16, 256>}]} {
    %cst = arith.constant 0.000000e+00 : f32
    %0 = vector.broadcast %cst : f32 to vector<16x1xf32>
    %c0 = arith.constant 0 : index
    %c0_0 = arith.constant 0 : index
    %1 = vector.load %arg5[%c0, %c0_0] : memref<16x1xf32, #tpu.memory_space<vmem>>, vector<16x1xf32>
    tpu.vector_store %arg5[%c0, %c0_0], %0 {strides = array<i32>} : memref<16x1xf32, #tpu.memory_space<vmem>>, vector<16x1xf32>,
    %c0_i32 = arith.constant 0 : i32
    %c1_i32 = arith.constant 1 : i32
    %2 = arith.muli %c0_i32, %c1_i32 : i32
    %c0_i32_1 = arith.constant 0 : i32
    %3 = arith.addi %c0_i32_1, %2 : i32
    %c256_i32 = arith.constant 256 : i32
    %4 = arith.muli %3, %c256_i32 : i32
    %5 = tpu.assume_multiple %4, 128 : i32
    %c0_2 = arith.constant 0 : index
    %c0_3 = arith.constant 0 : index
    %6 = arith.index_cast %5 : i32 to index
    %7 = vector.load %arg3[%c0_2, %c0_3, %6] : memref<1x16x256xf32, #tpu.memory_space<vmem>>, vector<1x16x256xf32>
    %8 = vector.shape_cast %7 : vector<1x16x256xf32> to vector<16x256xf32>
    %c0_4 = arith.constant 0 : index
    %c0_5 = arith.constant 0 : index
    %9 = vector.load %arg5[%c0_4, %c0_5] : memref<16x1xf32, #tpu.memory_space<vmem>>, vector<16x1xf32>
    %cst_6 = arith.constant dense<0.000000e+00> : vector<16xf32>
    %10 = vector.multi_reduction <add>, %8, %cst_6 [1] : vector<16x256xf32> to vector<16xf32>
    %11 = vector.shape_cast %10 : vector<16xf32> to vector<16x1xf32>
    %12 = arith.addf %9, %11 : vector<16x1xf32>
    %c0_7 = arith.constant 0 : index
    %c0_8 = arith.constant 0 : index
    %13 = vector.load %arg5[%c0_7, %c0_8] : memref<16x1xf32, #tpu.memory_space<vmem>>, vector<16x1xf32>
    tpu.vector_store %arg5[%c0_7, %c0_8], %12 {strides = array<i32>} : memref<16x1xf32, #tpu.memory_space<vmem>>, vector<16x1xf32>,
    %c1_i32_9 = arith.constant 1 : i32
    %c0_10 = arith.constant 0 : index
    %c0_11 = arith.constant 0 : index
    %14 = vector.load %arg5[%c0_10, %c0_11] : memref<16x1xf32, #tpu.memory_space<vmem>>, vector<16x1xf32>
    %cst_12 = arith.constant 3.906250e-03 : f32
    %15 = vector.broadcast %cst_12 : f32 to vector<16x1xf32>
    %16 = arith.mulf %14, %15 : vector<16x1xf32>
    %17 = tpu.iota {dimensions = array<i32: 0>} : vector<16x1xi32>
    %c0_13 = arith.constant 0 : index
    %18 = memref.load %arg2[%c0_13] : memref<1xf32, #tpu.memory_space<smem>>
    %19 = vector.broadcast %18 : f32 to vector<16x1xf32>
    %c1_i32_14 = arith.constant 1 : i32
    %20 = tpu.dynamic_rotate %16 by %c1_i32_14 dim 0 : vector<16x1xf32>, i32 -> vector<16x1xf32>
    %c1_i32_15 = arith.constant 1 : i32
    %21 = vector.broadcast %c1_i32_15 : i32 to vector<16x1xi32>
    %22 = arith.cmpi sge, %17, %21 : vector<16x1xi32>
    %c17_i32 = arith.constant 17 : i32
    %23 = vector.broadcast %c17_i32 : i32 to vector<16x1xi32>
    %24 = arith.cmpi slt, %17, %23 : vector<16x1xi32>
    %25 = arith.andi %22, %24 : vector<16x1xi1>
    %c0_16 = arith.constant 0 : index
    %26 = memref.load %arg1[%c0_16] : memref<3xf32, #tpu.memory_space<smem>>
    %cst_17 = arith.constant 0.000000e+00 : f32
    %27 = vector.broadcast %cst_17 : f32 to vector<16x1xf32>
    %28 = arith.select %25, %20, %27 : vector<16x1xi1>, vector<16x1xf32>
    %29 = vector.broadcast %26 : f32 to vector<16x1xf32>
    %30 = arith.mulf %29, %28 : vector<16x1xf32>
    %31 = arith.addf %19, %30 : vector<16x1xf32>
    %c0_i32_18 = arith.constant 0 : i32
    %32 = tpu.dynamic_rotate %16 by %c0_i32_18 dim 0 : vector<16x1xf32>, i32 -> vector<16x1xf32>
    %c0_i32_19 = arith.constant 0 : i32
    %33 = vector.broadcast %c0_i32_19 : i32 to vector<16x1xi32>
    %34 = arith.cmpi sge, %17, %33 : vector<16x1xi32>
    %c16_i32 = arith.constant 16 : i32
    %35 = vector.broadcast %c16_i32 : i32 to vector<16x1xi32>
    %36 = arith.cmpi slt, %17, %35 : vector<16x1xi32>
    %37 = arith.andi %34, %36 : vector<16x1xi1>
    %c1 = arith.constant 1 : index
    %38 = memref.load %arg1[%c1] : memref<3xf32, #tpu.memory_space<smem>>
    %cst_20 = arith.constant 0.000000e+00 : f32
    %39 = vector.broadcast %cst_20 : f32 to vector<16x1xf32>
    %40 = arith.select %37, %32, %39 : vector<16x1xi1>, vector<16x1xf32>
    %41 = vector.broadcast %38 : f32 to vector<16x1xf32>
    %42 = arith.mulf %41, %40 : vector<16x1xf32>
    %43 = arith.addf %31, %42 : vector<16x1xf32>
    %c15_i32 = arith.constant 15 : i32
    %44 = tpu.dynamic_rotate %16 by %c15_i32 dim 0 : vector<16x1xf32>, i32 -> vector<16x1xf32>
    %c-1_i32 = arith.constant -1 : i32
    %45 = vector.broadcast %c-1_i32 : i32 to vector<16x1xi32>
    %46 = arith.cmpi sge, %17, %45 : vector<16x1xi32>
    %c15_i32_21 = arith.constant 15 : i32
    %47 = vector.broadcast %c15_i32_21 : i32 to vector<16x1xi32>
    %48 = arith.cmpi slt, %17, %47 : vector<16x1xi32>
    %49 = arith.andi %46, %48 : vector<16x1xi1>
    %c2 = arith.constant 2 : index
    %50 = memref.load %arg1[%c2] : memref<3xf32, #tpu.memory_space<smem>>
    %cst_22 = arith.constant 0.000000e+00 : f32
    %51 = vector.broadcast %cst_22 : f32 to vector<16x1xf32>
    %52 = arith.select %49, %44, %51 : vector<16x1xi1>, vector<16x1xf32>
    %53 = vector.broadcast %50 : f32 to vector<16x1xf32>
    %54 = arith.mulf %53, %52 : vector<16x1xf32>
    %55 = arith.addf %43, %54 : vector<16x1xf32>
    %56 = arith.negf %55 : vector<16x1xf32>
    %57 = math.exp %56 : vector<16x1xf32>
    %cst_23 = arith.constant 1.000000e+00 : f32
    %58 = vector.broadcast %cst_23 : f32 to vector<16x1xf32>
    %59 = arith.addf %58, %57 : vector<16x1xf32>
    %60 = arith.divf %58, %59 : vector<16x1xf32>
    %c0_24 = arith.constant 0 : index
    %c0_25 = arith.constant 0 : index
    %61 = vector.load %arg5[%c0_24, %c0_25] : memref<16x1xf32, #tpu.memory_space<vmem>>, vector<16x1xf32>
    tpu.vector_store %arg5[%c0_24, %c0_25], %60 {strides = array<i32>} : memref<16x1xf32, #tpu.memory_space<vmem>>, vector<16x1xf32>,
    %c0_i32_26 = arith.constant 0 : i32
    %c1_i32_27 = arith.constant 1 : i32
    %62 = arith.muli %c0_i32_26, %c1_i32_27 : i32
    %c0_i32_28 = arith.constant 0 : i32
    %63 = arith.addi %c0_i32_28, %62 : i32
    %c256_i32_29 = arith.constant 256 : i32
    %64 = arith.muli %63, %c256_i32_29 : i32
    %65 = tpu.assume_multiple %64, 128 : i32
    %c0_30 = arith.constant 0 : index
    %c0_31 = arith.constant 0 : index
    %66 = vector.load %arg5[%c0_30, %c0_31] : memref<16x1xf32, #tpu.memory_space<vmem>>, vector<16x1xf32>
    %c0_32 = arith.constant 0 : index
    %c0_33 = arith.constant 0 : index
    %67 = arith.index_cast %65 : i32 to index
    %68 = vector.load %arg3[%c0_32, %c0_33, %67] : memref<1x16x256xf32, #tpu.memory_space<vmem>>, vector<1x16x256xf32>
    %69 = vector.shape_cast %68 : vector<1x16x256xf32> to vector<16x256xf32>
    %70 = vector.broadcast %66 : vector<16x1xf32> to vector<16x256xf32>
    %71 = arith.mulf %69, %70 : vector<16x256xf32>
    %c0_34 = arith.constant 0 : index
    %c0_35 = arith.constant 0 : index
    %72 = arith.index_cast %65 : i32 to index
    %73 = vector.load %arg4[%c0_34, %c0_35, %72] : memref<1x16x256xf32, #tpu.memory_space<vmem>>, vector<1x16x256xf32>
    %74 = vector.shape_cast %73 : vector<1x16x256xf32> to vector<16x256xf32>
    %75 = vector.shape_cast %71 : vector<16x256xf32> to vector<1x16x256xf32>
    tpu.vector_store %arg4[%c0_34, %c0_35, %72], %75 {strides = array<i32>} : memref<1x16x256xf32, #tpu.memory_space<vmem>>, vector<1x16x256xf32>,
    %c1_i32_36 = arith.constant 1 : i32
    return
  }
  func.func @transform_0(%arg0: i32) -> i32 {
    %c0_i32 = arith.constant 0 : i32
    %c0_i32_0 = arith.constant 0 : i32
    return %c0_i32 : i32
  }
  func.func @transform_1(%arg0: i32) -> i32 {
    %c0_i32 = arith.constant 0 : i32
    %c0_i32_0 = arith.constant 0 : i32
    return %c0_i32 : i32
  }
  func.func @transform_2(%arg0: i32) -> (i32, i32, i32) {
    %c0_i32 = arith.constant 0 : i32
    %c0_i32_0 = arith.constant 0 : i32
    %c0_i32_1 = arith.constant 0 : i32
    return %arg0, %c0_i32, %c0_i32_0 : i32, i32, i32
  }
  func.func @transform_3(%arg0: i32) -> (i32, i32, i32) {
    %c0_i32 = arith.constant 0 : i32
    %c0_i32_0 = arith.constant 0 : i32
    %c0_i32_1 = arith.constant 0 : i32
    return %arg0, %c0_i32, %c0_i32_0 : i32, i32, i32
  }
}

</mosaic_0001>

<bundles_post_ra>
// kernel: tpu_custom_call.1
= control target key start
LH: loop header
LB: loop body
LE: loop exit
PB: predicated region body
PF: predicated region fallthrough
CT: control target
= control target key end

     0   :  { %s885_s0 = inlined_call_operand.vmem [shape: f32[3], index: 0, kind: input, shape index: {}]   ;;  %s886_s1 = inlined_call_operand.<no memory space> [shape: f32[1], index: 1, kind: input, shape index: {}]   ;;  %s887_s2 = inlined_call_operand.hbm [shape: f32[2,16,256], index: 2, kind: input, shape index: {}]   ;;  %s888_s3 = inlined_call_operand.hbm [shape: f32[2,16,256], index: 3, kind: output, shape index: {}]  }
   0x1   :  { %8 = sst [smem:[#allocation3]] %s886_s1 }
   0x2   :  { %9 = vsyncpa [#allocation7], 0 }
   0x3   :  { %10 = vsyncpa [#allocation5], 0 }
   0x4   :  { %12 = vsyncpa [#allocation5 + $0x1], 0 }
   0x5   :  { %13 = vsyncpa [#allocation6], 0 }
   0x6   :  { %15 = vsyncpa [#allocation6 + $0x1], 0  ;;  %s665_s14 = smov 0   ;;  %s667_s15 = smov 0  }
   0x7   :  { %s669_s16 = smov 0   ;;  %s671_s17 = smov 0  }
   0x8 LB: > { %s686_s1 = sadd.s32 4294967295, %s631_s17   ;;  %s421_s18 = sadd.s32 4294967294, %s631_s17   ;;  %s631_s17 = sphi %s671_s17, %s908_s17   ;;  %s627_s16 = sphi %s669_s16, %s907_s16   ;;  %s623_s15 = sphi %s667_s15, %s906_s15   ;;  %s619_s14 = sphi %s665_s14, %s905_s14  }
   0x9   : > { %s690_s19 = sadd.s32 1, %s631_s17   ;;  %s70_s20 = sadd.s32 1, %s627_s16 }
   0xa   : > { %s67_s21 = ssub.s32 %s631_s17, %s690_s19  ;;  %p77_p0 = scmp.ne.s32.totalorder %s627_s16, %s623_s15 }
   0xb   : > { %p68_p1 = scmp.eq.s32.totalorder %s67_s21, 0  ;;  %p78_p2 = scmp.eq.s32.totalorder %s631_s17, 0 }
   0xc   : > { %p83_p3 = scmp.ne.s32.totalorder %s623_s15, %s619_s14  ;;  %p890_p4 = scmp.eq.s32.totalorder %s686_s1, 0 }
   0xd   : > { %s702_s22 = scalar_select %p68_p1, %s627_s16, %s70_s20  }
   0xe   : > { %p704_p5 = por %p78_p2, %p77_p0  ;;  %p710_p6 = por %p890_p4, %p83_p3 }
   0xf   : > { %p107_p7 = scmp.eq.s32.totalorder %s686_s1, 1  ;;  %p113_p8 = scmp.eq.s32.totalorder %s421_s18, 1 }
  0x10   : > { %s893_s24 = scalar_select %p710_p6, 1, 0 }
  0x11   : > { %p422_p9 = scmp.ge.s32.totalorder %s631_s17, 1  ;;  %p120_p10 = scmp.lt.s32.totalorder %s631_s17, 3 }
  0x12   : > { %p717_p11 = por %p107_p7, %p77_p0  ;;  %p721_p12 = por %p113_p8, %p83_p3 }
  0x13   : > { %p725_p13 = pnand %p422_p9, %p120_p10  ;;  %s133_s30 = sshll.u32 %s885_s0, 4  ;;  %s134_s30 = int_to_ptr.vmem [resolvable:$true] %s133_s30 }
  0x14   : > { %s894_s25 = scalar_select %p717_p11, 1, 0 }
  0x15   : > { %s895_s26 = scalar_select %p721_p12, 1, 0 }
  0x16   : > { %p451_p1 = pneg %p725_p13  ;;  %p464_p2 = scmp.lt.s32.totalorder %s631_s17, 2 }
  0x17   : > { %s147_s5 = sand.u32 1, %s627_s16   ;;  %s516_s8 = scalar_lea.vmem %s134_s30, 16 }
  0x18   : > { %p738_p7 = pnand %p451_p1, %p890_p4  ;;  %p745_p3 = pnand %p464_p2, %p704_p5 }
  0x19   : > { %s425_s7 = sshll.u32 %s147_s5, 5  ;;  %p517_p8 = scmp.ne.s32.totalorder %s134_s30, %s516_s8 }
  0x1a   : > { %p518_p9 = pneg %p738_p7  ;;  %p524_p12 = scmp.lt.s32.totalorder %s134_s30, %s134_s30 }
  0x1b   : > { %p525_p11 = scmp.lt.s32.totalorder %s516_s8, %s516_s8 }
  0x1c   : > { %p519_p10 = pnand %p518_p9, %p517_p8 }
  0x1d   : > { %p526_p1 = por %p525_p11, %p524_p12 }
  0x1e   : > { %p520_p0 = pneg %p519_p10 }
  0x20   : > { %p527_p4 = pnand %p526_p1, %p520_p0 }
  0x22   : > { %530 = shalt.err (!%p527_p4)
}
  0x23   : > { %s633_s9 = smov [#allocation4]   ;;  %s441_s10 = sshll.u32 %s631_s17, 9 }
  0x24   : > { %454 = dma.vmem_to_smem (!%p738_p7), %s134_s30, 16, %s633_s9, [#allocation7]  }
  0x25   : > { %s151_s11 = scalar_lea.vmem [#allocation8], %s425_s7  ;;  %s757_s20 = scalar_lea.hbm %s887_s2, %s441_s10 }
  0x26   : > { %s158_s12 = sshll.u32 %s151_s11, 4  ;;  %s761_s21 = scalar_lea.sflag [#allocation5], %s147_s5  ;;  %s759_s12 = int_to_ptr.vmem [resolvable:$true] %s158_s12 }
  0x27   : > { %s531_s23 = scalar_lea.hbm %s757_s20, 512  ;;  %p533_p5 = pneg %p745_p3 }
  0x28   : > { %p532_p4 = scmp.ne.s32.totalorder %s757_s20, %s531_s23  ;;  %s536_s30 = scalar_lea.hbm %s887_s2, 1024 }
  0x29   : > { %p537_p0 = scmp.lt.u32.totalorder %s757_s20, %s887_s2  ;;  %p538_p2 = scmp.lt.u32.totalorder %s536_s30, %s531_s23 }
  0x2a   : > { %p534_p11 = pnand %p533_p5, %p532_p4  ;;  %p540_p8 = scmp.lt.u32.totalorder %s531_s23, %s757_s20 }
  0x2b   : > { %p539_p7 = por %p538_p2, %p537_p0 }
  0x2c   : > { %p535_p12 = pneg %p534_p11 }
  0x2d   : > { %p541_p9 = por %p540_p8, %p539_p7 }
  0x2f   : > { %p542_p10 = pnand %p541_p9, %p535_p12 }
  0x31   : > { %545 = shalt.err (!%p542_p10)
}
  0x32   : > { %s546_s5 = scalar_lea.vmem %s759_s12, 512  ;;  %s634_s8 = smov [#allocation8]  }
  0x33   : > { %p547_p1 = scmp.ne.s32.totalorder %s759_s12, %s546_s5  ;;  %s551_s9 = sshll.u32 %s634_s8, 4  ;;  %s552_s9 = int_to_ptr.vmem [resolvable:$false] %s551_s9 }
  0x34   : > { %s553_s10 = scalar_lea.vmem %s552_s9, 1024  ;;  %p554_p6 = scmp.lt.s32.totalorder %s759_s12, %s552_s9 }
  0x35   : > { %p549_p4 = pnand %p547_p1, %p533_p5  ;;  %p555_p0 = scmp.lt.s32.totalorder %s553_s10, %s546_s5 }
  0x37   : > { %p550_p11 = pneg %p549_p4  ;;  %p556_p2 = por %p555_p0, %p554_p6 }
  0x39   : > { %p557_p7 = pnand %p556_p2, %p550_p11 }
  0x3b   : > { %560 = shalt.err (!%p557_p7)
}
  0x3c   : > { %s635_s11 = smov 256   ;;  %s636_s13 = smov 16  }
  0x3d   : > { %458 = dma.hbm_to_vmem [thread:$0]  (!%p745_p3), %s757_s20, 512, %s759_s12, %s761_s21, %s635_s11, %s635_s11, %s636_s13  }
  0x3e   : > { %170 = sbr.rel (%p725_p13) target bundleno = 432 (0x1b0), region = 32  ;;  %p899_p5 = scmp.eq.s32.totalorder (!%p725_p13), %s686_s1, 0 }
  0x45   : > { %606 = dma.done.wait (%p899_p5), [#allocation7], 16   ;;  %p900_p12 = pmov %p899_p5 }
  0x46   : > { %s796_s18 = sand.u32 1, %s623_s15   ;;  %p901_p6 = scmp.ne.s32.totalorder %s893_s24, 0 }
  0x47   : > { %608 = vsyncadd (%p900_p12), [#allocation7], 4294967280  ;;  %s430_s23 = sshll.u32 %s796_s18, 5  ;;  %s177_s28 = scalar_lea.sflag [#allocation5], %s796_s18 }
  0x48   : > { %s180_s6 = scalar_lea.vmem [#allocation8], %s430_s23 }
  0x49   : > { %610 = dma.done.wait (%p901_p6), %s177_s28, 512  }
  0x4a   : > { %612 = vsyncadd (%p901_p6), %s177_s28, 4294966784 }
  0x4b   : > { %185 = sfence }
  0x4c   : > { %v806_v0 = vld [vmem:[%s180_s6] sm:$0xff]  ;;  %v808_v1 = vld [vmem:[%s180_s6 + $0x8] sm:$0xff]  ;;  %v810_v2 = vld [vmem:[%s180_s6 + $0x10] sm:$0xff]  ;;  %vm204_vm0 = vcmask 7168   ;;  %v637_v6 = vmov 0.0   ;;  %v638_v7 = vmov 0   ;;  %v227_v14 = vlaneseq }
  0x4d   : > { %v213_v3 = vadd.f32 %v808_v1, %v806_v0  ;;  %v814_v4 = vld [vmem:[%s180_s6 + $0x18] sm:$0xff]  ;;  %205 = vst.msk [vmem:[#allocation2] sm:$0xff] %vm204_vm0, %v637_v6  ;;  %206 = vst.msk [vmem:[#allocation2 + $0x8] sm:$0xff] %vm204_vm0, %v637_v6  ;;  %506 = vset.pattern.permute.xlu1 %v638_v7  ;;  %507 = vset.pattern.permute.xlu0 %v638_v7  ;;  %s243_s24 = sld [smem:[#allocation4]]  ;;  %s432_s12 = sld [smem:[#allocation4 + $0x1]] }
  0x4e   : > { %v216_v5 = vadd.f32 %v814_v4, %v810_v2  ;;  %v228_v15 = vshrl.u32 %v227_v14, 7  ;;  %s230_s27 = sld [smem:[#allocation3]]  ;;  %s822_s20 = sld [smem:[#allocation4 + $0x2]] }
  0x4f   : > { %214 = vadd.xlane.f32.xlu0 %v213_v3  ;;  %s203_s21 = scalar_lea.vmem [#allocation9], %s430_s23  ;;  %s442_s30 = sshll.u32 %s686_s1, 9 }
  0x50   : > { %v229_v18 = vadd.s32 8, %v228_v15  ;;  %vm234_vm1 = vcmp.lt.s32.totalorder %v228_v15, 1  ;;  %vm237_vm2 = vcmp.ge.s32.totalorder %v228_v15, 1  ;;  %vm267_vm3 = vcmp.lt.s32.totalorder %v228_v15, 7  ;;  %s336_s29 = sshll.u32 %s203_s21, 4  ;;  %s839_s5 = scalar_lea.hbm %s888_s3, %s442_s30  ;;  %s834_s29 = int_to_ptr.vmem [resolvable:$true] %s336_s29 }
  0x51   : > { %s323_s1 = scalar_lea.sflag [#allocation6], %s796_s18  ;;  %s561_s8 = scalar_lea.vmem %s834_s29, 512 }
  0x52   : > { %vm273_vm4 = vcmp.lt.s32.totalorder %v229_v18, 15  ;;  %p562_p13 = scmp.ne.s32.totalorder %s834_s29, %s561_s8  ;;  %p902_p3 = scmp.ne.s32.totalorder %s894_s25, 0 }
  0x53   : > { %217 = vadd.xlane.f32.xlu0 %v216_v5  ;;  %v246_v21 = vstv %s243_s24  ;;  %v260_v30 = vstv %s432_s12  ;;  %s639_s9 = smov [#allocation9]  }
  0x54   : > { %v211_v8 = vld [vmem:[#allocation2] sm:$0xff]  ;;  %v212_v11 = vld [vmem:[#allocation2 + $0x8] sm:$0xff]  ;;  %v231_v26 = vstv %s230_s27  ;;  %v279_v33 = vstv %s822_s20  ;;  %p563_p8 = pnand %p562_p13, %p902_p3  ;;  %s565_s10 = sshll.u32 %s639_s9, 4  ;;  %s566_s10 = int_to_ptr.vmem [resolvable:$false] %s565_s10 }
  0x55   : > { %s567_s11 = scalar_lea.vmem %s566_s10, 1024  ;;  %p568_p10 = scmp.lt.s32.totalorder %s834_s29, %s566_s10 }
  0x56   : > { %p564_p9 = pneg %p563_p8  ;;  %p569_p1 = scmp.lt.s32.totalorder %s567_s11, %s561_s8 }
  0x58   : > { %p570_p4 = por %p569_p1, %p568_p10 }
  0x5a   : > { %p571_p11 = pnand %p570_p4, %p564_p9 }
  0xdc   : > { %v215_v9 = vpop.xlane.xlu0 %214 }
  0xdd   : > { %v219_v10 = vadd.f32 %v215_v9, %v211_v8 }
  0xdf   : > { %221 = vst.msk [vmem:[#allocation2] sm:$0xff] %vm204_vm0, %v219_v10 }
  0xe0   : > { %v218_v12 = vpop.xlane.xlu0 %217 }
  0xe1   : > { %v220_v13 = vadd.f32 %v218_v12, %v212_v11 }
  0xe3   : > { %222 = vst.msk [vmem:[#allocation2 + $0x8] sm:$0xff] %vm204_vm0, %v220_v13 }
  0xe6   : > { %v223_v16 = vld [vmem:[#allocation2] sm:$0xff] }
  0xe7   : > { %v225_v17 = vmul.f32 0.00390625, %v223_v16 }
  0xe9   : > { %v232_v22 = vrot.slane %v225_v17, 7  ;;  %v265_v24 = vrot.slane %v225_v17, 1  ;;  %v261_v40 = vmul.f32 %v260_v30, %v225_v17 }
  0xea   : > { %v224_v19 = vld [vmem:[#allocation2 + $0x8] sm:$0xff] }
  0xeb   : > { %v226_v20 = vmul.f32 0.00390625, %v224_v19 }
  0xed   : > { %v233_v23 = vrot.slane %v226_v20, 7  ;;  %v266_v25 = vrot.slane %v226_v20, 1  ;;  %v262_v37 = vmul.f32 %v260_v30, %v226_v20 }
  0xef   : > { %v235_v27 = vsel %vm234_vm1, %v232_v22, %v233_v23  ;;  %v236_v28 = vsel %vm234_vm1, %v233_v23, %v232_v22  ;;  %v269_v29 = vsel %vm267_vm3, %v266_v25, %v265_v24  ;;  %v268_v38 = vsel %vm267_vm3, %v265_v24, %v266_v25 }
  0xf0   : > { %v244_v31 = vsel %vm237_vm2, %v236_v28, 0.0  ;;  %v248_v32 = vmul.f32 %v246_v21, %v235_v27  ;;  %v278_v35 = vsel %vm273_vm4, %v269_v29, 0.0  ;;  %v280_v44 = vmul.f32 %v279_v33, %v268_v38 }
  0xf1   : > { %v247_v34 = vmul.f32 %v246_v21, %v244_v31  ;;  %v281_v42 = vmul.f32 %v279_v33, %v278_v35 }
  0xf2   : > { %v250_v36 = vadd.f32 %v248_v32, %v231_v26 }
  0xf3   : > { %v249_v39 = vadd.f32 %v247_v34, %v231_v26 }
  0xf4   : > { %v264_v41 = vadd.f32 %v262_v37, %v250_v36 }
  0xf5   : > { %v263_v43 = vadd.f32 %v261_v40, %v249_v39 }
  0xf6   : > { %v283_v45 = vadd.f32 %v281_v42, %v264_v41 }
  0xf7   : > { %v282_v46 = vadd.f32 %v280_v44, %v263_v43 }
  0xf8   : > { %v435_v47 = vmul.f32 -1.442695, %v283_v45 }
  0xf9   : > { %v434_v48 = vmul.f32 -1.442695, %v282_v46 }
  0xfa   : > { %508 = vpow2.f32 %v435_v47 }
  0xfb   : > { %510 = vpow2.f32 %v434_v48 }
 0x104   : > { %v509_v49 = vpop.eup %508 }
 0x105   : > { %v511_v50 = vpop.eup %510  ;;  %v291_v51 = vadd.f32 1.0, %v509_v49 }
 0x106   : > { %v290_v52 = vadd.f32 1.0, %v511_v50 }
 0x107   : > { %512 = vrcp.f32 %v291_v51 }
 0x108   : > { %514 = vrcp.f32 %v290_v52 }
 0x111   : > { %v513_v53 = vpop.eup %512 }
 0x112   : > { %v515_v54 = vpop.eup %514  ;;  %297 = vst.msk [vmem:[#allocation2 + $0x8] sm:$0xff] %vm204_vm0, %v513_v53 }
 0x113   : > { %296 = vst.msk [vmem:[#allocation2] sm:$0xff] %vm204_vm0, %v515_v54 }
 0x119   : > { %v299_v56 = vld [vmem:[#allocation2 + $0x8] sm:$0xff] }
 0x11a   : > { %v298_v55 = vld [vmem:[#allocation2] sm:$0xff] }
 0x11b   : > { %306 = vperm.xlu1 %506, %v298_v55  }
 0x11f   : > { %311 = vperm.xlu1 %506, %v299_v56  }
 0x19a   : > { %v307_v57 = vpop.permute.xlu1 %306 }
 0x19b   : > { %v314_v58 = vmul.f32 %v307_v57, %v806_v0  ;;  %v315_v59 = vmul.f32 %v307_v57, %v808_v1 }
 0x19d   : > { %318 = vst [vmem:[%s203_s21] sm:$0xff] %v314_v58  ;;  %319 = vst [vmem:[%s203_s21 + $0x8] sm:$0xff] %v315_v59 }
 0x19e   : > { %v312_v60 = vpop.permute.xlu1 %311 }
 0x19f   : > { %v316_v61 = vmul.f32 %v312_v60, %v810_v2  ;;  %v317_v62 = vmul.f32 %v312_v60, %v814_v4 }
 0x1a1   : > { %320 = vst [vmem:[%s203_s21 + $0x10] sm:$0xff] %v316_v61  ;;  %321 = vst [vmem:[%s203_s21 + $0x18] sm:$0xff] %v317_v62 }
 0x1a2   : > { %574 = shalt.err (!%p571_p11)
}
 0x1a3   : > { %s575_s13 = scalar_lea.hbm %s839_s5, 512  ;;  %s579_s6 = scalar_lea.hbm %s888_s3, 1024 }
 0x1a4   : > { %p576_p0 = scmp.ne.s32.totalorder %s839_s5, %s575_s13  ;;  %p580_p5 = scmp.lt.u32.totalorder %s839_s5, %s888_s3 }
 0x1a5   : > { %p581_p12 = scmp.lt.u32.totalorder %s579_s6, %s575_s13  ;;  %p583_p13 = scmp.lt.u32.totalorder %s575_s13, %s839_s5 }
 0x1a6   : > { %p577_p2 = pnand %p576_p0, %p902_p3 }
 0x1a7   : > { %p582_p6 = por %p581_p12, %p580_p5 }
 0x1a8   : > { %p578_p7 = pneg %p577_p2 }
 0x1a9   : > { %p584_p8 = por %p583_p13, %p582_p6 }
 0x1ab   : > { %p585_p9 = pnand %p584_p8, %p578_p7 }
 0x1ad   : > { %588 = shalt.err (!%p585_p9)
}
 0x1ae   : > { %s640_s12 = smov 256   ;;  %s641_s20 = smov 16  }
 0x1af   : > { %449 = dma.vmem_to_hbm [thread:$0]  (%p902_p3), %s834_s29, 512, %s839_s5, %s323_s1, %s640_s12, %s640_s12, %s641_s20  }
 0x1b0 PF: > { %s351_s21 = sand.u32 1, %s619_s14   ;;  %p903_p10 = scmp.ne.s32.totalorder %s895_s26, 0 }
 0x1b1   : > { %p904_p1 = scmp.ge.s32.totalorder %s631_s17, 2  ;;  %s352_s30 = scalar_lea.sflag [#allocation6], %s351_s21 }
 0x1b3   : > { %p460_p4 = pnand %p904_p1, %p903_p10 }
 0x1b5   : > { %614 = dma.done.wait (!%p460_p4), %s352_s30, 512  }
 0x1b6   : > { %616 = vsyncadd (!%p460_p4), %s352_s30, 4294966784  ;;  %p18_p11 = scmp.ge.s32.totalorder %s690_s19, 4   ;;  %s905_s14 = smov %s623_s15 }
 0x1b7   : > { %s906_s15 = smov %s627_s16  ;;  %s907_s16 = smov %s702_s22 }
 0x1b8   : > { %s908_s17 = smov %s690_s19  ;;  %20 = sbr.rel (!%p18_p11) target bundleno = 8 (0x8), region = 82 }
 0x1bf   :  { %357 = vsyncpa [#allocation5], 1 }
 0x1c0   :  { %359 = vsyncpa [#allocation5 + $0x1], 1 }
 0x1c1   :  { %360 = vsyncpa [#allocation6], 1 }
 0x1c2   :  { %362 = vsyncpa [#allocation6 + $0x1], 1 }
 0x1c3   :  { %363 = vsyncpa [#allocation7], 1 }
 0x1c4   :  { %365 = vsyncpa [#allocation7 + $0x1], 1 }

</bundles_post_ra>
